<compile_context>
chip_gen: v7x
topology: tpu7x:2x2x1
jax: 0.10.0
libtpu: 0.0.40
codegen_flags: <defaults>
</compile_context>

<pallas_src>
import functools

import jax
import jax.numpy as jnp
from jax.experimental import pallas as pl
from jax.experimental.pallas import tpu as pltpu


# ----------------------------- Pallas kernel --------------------------------
def vaefm_kernel(x_t_ref, x_tp1_ref, a_t_ref, eps_ref,
                 w1_ref, w2_ref, wr_ref, wc_ref, b_ref,
                 lwm_ref, scal_ref, *, dims):
    B, X, A, Z, H = dims
    f32 = jnp.float32

    x_t = x_t_ref[...]          # (B, X)
    x_tp1 = x_tp1_ref[...]      # (B, X)
    a_t = a_t_ref[...]          # (B, A)
    eps = eps_ref[...]          # (B, Z)

    w1 = w1_ref[...]            # (X, 2H)     [w_te1 | w_e1]          (lane concat)
    w2 = w2_ref[...]            # (2H, 3Z)    block-diag(w_tmu, [w_mu|w_lv])
    wr = wr_ref[...]            # (2Z+A, H)   [w_d1; w_f1z; w_f1a]    (sublane concat)
    wc = wc_ref[...]            # (H, X+Z)    [w_d2 | w_f2]           (lane concat)
    bias = b_ref[...]           # (8, 128)    one bias vector per sublane row

    # static slices of the packed slabs (layout only, no compute)
    w_d1 = wr[0:Z]
    w_f1z = wr[Z:2 * Z]
    w_f1a = wr[2 * Z:2 * Z + A]
    w_d2 = wc[:, 0:X]
    w_f2 = wc[:, X:X + Z]

    b1 = bias[0:1, :2 * H]      # [b_te1 | b_e1]
    b2 = bias[1:2, :3 * Z]      # [b_tmu | b_mu | b_lv]
    b_d1 = bias[2:3, :H]
    b_d2 = bias[3:4, :X]
    b_f1 = bias[4:5, :H]
    b_f2 = bias[5:6, :Z]

    def dot(a, b):
        return jnp.dot(a, b, preferred_element_type=f32)

    # ---- fused encoder layer-1: target-enc + VAE-enc in ONE dot -------------
    # rows 0:B  cols 0:H   -> relu(x_t   @ w_te1 + b_te1)   (target enc, x_t)
    # rows B:2B cols 0:H   -> relu(x_tp1 @ w_te1 + b_te1)   (target enc, x_tp1)
    # rows 0:B  cols H:2H  -> relu(x_t   @ w_e1  + b_e1)    (VAE enc,    x_t)
    # rows B:2B cols H:2H  -> unused garbage (killed by the zero block of w2)
    xx = jnp.concatenate([x_t, x_tp1], axis=0)               # (2B, X)
    act1 = jnp.maximum(dot(xx, w1) + b1, 0.0)                 # (2B, 2H)

    # ---- fused heads: target mu-head + [mu|logvar] head in ONE dot ----------
    # w2 is block-diagonal so the off-block garbage lanes never pollute.
    out2 = dot(act1, w2) + b2                                  # (2B, 3Z)
    z_t = out2[0:B, 0:Z]
    z_tp1 = out2[B:2 * B, 0:Z]
    mu = out2[0:B, Z:2 * Z]
    logvar = out2[0:B, 2 * Z:3 * Z]

    # ---- forward model on (z_t, a_t) ----------------------------------------
    # layer-1 kept as two dots accumulating into one f32 result (no in-kernel
    # lane concat of activations; on v7x the MRB can fold the accumulate).
    h_f = jnp.maximum(dot(z_t, w_f1z) + dot(a_t, w_f1a) + b_f1, 0.0)
    z_diff = dot(h_f, w_f2) + b_f2                             # (B, Z)

    diff = (z_t + z_diff) - z_tp1
    lwm_vec = jnp.sum(diff * diff, axis=1, keepdims=True)      # (B, 1)
    # lane-dense write (unmasked vst); wrapper reads column 0.
    lwm_ref[...] = jnp.broadcast_to(lwm_vec, lwm_ref.shape)

    # ---- VAE decoder + losses on x_t -----------------------------------------
    std = jnp.exp(0.5 * logvar)
    z = mu + std * eps
    h_d = jnp.maximum(dot(z, w_d1) + b_d1, 0.0)
    x_hat = dot(h_d, w_d2) + b_d2
    rec = x_hat - x_t
    recon = jnp.sum(rec * rec, axis=1, keepdims=True)          # (B, 1)
    kld = -0.5 * jnp.sum(1.0 + logvar - mu * mu - jnp.exp(logvar),
                         axis=1, keepdims=True)                # (B, 1)

    inv_b = 1.0 / B
    loss_wm = jnp.sum(lwm_vec) * inv_b
    vae_loss = jnp.sum(recon + kld) * inv_b

    # scalar losses -> SMEM output (no lane concat / masked partial store)
    scal_ref[0] = vae_loss + loss_wm
    scal_ref[1] = loss_wm
    scal_ref[2] = vae_loss


# ----------------------------- parameters ------------------------------------
def init_params(key, x_dim, a_dim, z_dim, h_dim):
    ks = jax.random.split(key, 20)
    s = 0.1

    def w(k, shape):
        return jax.random.normal(k, shape, jnp.float32) * s

    p = {
        # VAE encoder
        "w_e1": w(ks[0], (x_dim, h_dim)), "b_e1": w(ks[1], (1, h_dim)),
        "w_mu": w(ks[2], (h_dim, z_dim)), "b_mu": w(ks[3], (1, z_dim)),
        "w_lv": w(ks[4], (h_dim, z_dim)), "b_lv": w(ks[5], (1, z_dim)),
        # VAE decoder
        "w_d1": w(ks[6], (z_dim, h_dim)), "b_d1": w(ks[7], (1, h_dim)),
        "w_d2": w(ks[8], (h_dim, x_dim)), "b_d2": w(ks[9], (1, x_dim)),
        # forward model
        "w_f1z": w(ks[10], (z_dim, h_dim)), "w_f1a": w(ks[11], (a_dim, h_dim)),
        "b_f1": w(ks[12], (1, h_dim)),
        "w_f2": w(ks[13], (h_dim, z_dim)), "b_f2": w(ks[14], (1, z_dim)),
    }
    # Target encoder: deepcopy of vae.encoder at init, drifts via soft-target
    # EMA during training -> it has its own parameters.  Perturb to emulate
    # post-update drift and verify the kernel consumes the separate weights.
    p["w_te1"] = p["w_e1"] + 0.1 * w(ks[15], (x_dim, h_dim))
    p["b_te1"] = p["b_e1"] + 0.1 * w(ks[16], (1, h_dim))
    p["w_tmu"] = p["w_mu"] + 0.1 * w(ks[17], (h_dim, z_dim))
    p["b_tmu"] = p["b_mu"] + 0.1 * w(ks[18], (1, z_dim))
    return p


def pack_params(p):
    """Pack all weights/biases into 5 slabs.  Built ONCE, reused every step."""
    x_dim, h_dim = p["w_e1"].shape
    z_dim = p["w_mu"].shape[1]
    a_dim = p["w_f1a"].shape[0]
    assert 2 * h_dim <= 128, "fused encoder layer-1 must fit one 128-lane tile"
    assert 3 * z_dim <= 128, "fused head output must fit one 128-lane tile"
    assert max(x_dim, h_dim, z_dim) <= 128, "bias slab uses one 128-lane row per bias"

    # Fused encoder layer-1: lane-concat of target-enc and VAE-enc weights.
    w1 = jnp.concatenate([p["w_te1"], p["w_e1"]], axis=1)               # (X, 2H)

    # Fused heads: block-diagonal so garbage lanes of the stacked activation
    # never pollute the selected outputs.
    top = jnp.concatenate(
        [p["w_tmu"], jnp.zeros((h_dim, 2 * z_dim), jnp.float32)], axis=1)
    bot = jnp.concatenate(
        [jnp.zeros((h_dim, z_dim), jnp.float32), p["w_mu"], p["w_lv"]], axis=1)
    w2 = jnp.concatenate([top, bot], axis=0)                            # (2H, 3Z)

    # "rows" slab: weights whose OUTPUT dim is H, stacked along sublanes.
    wr = jnp.concatenate([p["w_d1"], p["w_f1z"], p["w_f1a"]], axis=0)   # (2Z+A, H)
    # "cols" slab: weights whose INPUT dim is H, stacked along lanes.
    wc = jnp.concatenate([p["w_d2"], p["w_f2"]], axis=1)                # (H, X+Z)

    def row(b):
        b = b.reshape(1, -1)
        return jnp.pad(b, ((0, 0), (0, 128 - b.shape[1])))

    bias = jnp.concatenate(
        [row(jnp.concatenate([p["b_te1"], p["b_e1"]], axis=1)),
         row(jnp.concatenate([p["b_tmu"], p["b_mu"], p["b_lv"]], axis=1)),
         row(p["b_d1"]), row(p["b_d2"]), row(p["b_f1"]), row(p["b_f2"]),
         jnp.zeros((2, 128), jnp.float32)], axis=0)                     # (8, 128)
    return {"w1": w1, "w2": w2, "wr": wr, "wc": wc, "bias": bias}


# ----------------------------- wrapper ---------------------------------------
@jax.jit
def vaefm_forward(x_t, a_t, x_tp1, eps, packed):
    B, X = x_t.shape
    A = a_t.shape[1]
    Z = eps.shape[1]
    H = packed["w1"].shape[1] // 2

    # Sublane-offset slices inside the kernel ([0:B], [B:2B]) require B to be
    # a multiple of 8; otherwise Mosaic materializes relayout copies.
    assert B % 8 == 0, "batch size must be a multiple of 8 (sublane alignment)"
    assert 2 * H <= 128 and 3 * Z <= 128 and X <= 128

    kernel = functools.partial(vaefm_kernel, dims=(B, X, A, Z, H))

    flops = 2 * (2 * B * X * 2 * H          # fused encoder layer-1
                 + 2 * B * 2 * H * 3 * Z    # fused heads
                 + B * Z * H + B * A * H    # forward model layer-1
                 + B * H * Z                # forward model layer-2
                 + B * Z * H + B * H * X)   # decoder
    bytes_in = 4 * (x_t.size + x_tp1.size + a_t.size + eps.size
                    + packed["w1"].size + packed["w2"].size
                    + packed["wr"].size + packed["wc"].size
                    + packed["bias"].size)
    bytes_out = 4 * (B * 128 + 3)

    lwm, scalars = pl.pallas_call(
        kernel,
        out_shape=(
            jax.ShapeDtypeStruct((B, 128), jnp.float32),  # lane-dense per-sample loss
            jax.ShapeDtypeStruct((3,), jnp.float32),      # [loss, loss_wm, vae_loss]
        ),
        in_specs=[pl.BlockSpec(memory_space=pltpu.MemorySpace.VMEM)] * 9,
        out_specs=(
            pl.BlockSpec(memory_space=pltpu.MemorySpace.VMEM),
            pl.BlockSpec(memory_space=pltpu.MemorySpace.SMEM),
        ),
        cost_estimate=pl.CostEstimate(
            flops=flops, transcendentals=2 * B * Z,
            bytes_accessed=bytes_in + bytes_out),
    )(x_t, x_tp1, a_t, eps,
      packed["w1"], packed["w2"], packed["wr"], packed["wc"], packed["bias"])
    return lwm[:, 0], scalars[0], scalars[1], scalars[2]


# ----------------------------- pure-JAX reference -----------------------------
def vaefm_reference(x_t, a_t, x_tp1, eps, p):
    def tgt_mu(x):
        h = jax.nn.relu(x @ p["w_te1"] + p["b_te1"])
        return h @ p["w_tmu"] + p["b_tmu"]

    z_t, z_tp1 = tgt_mu(x_t), tgt_mu(x_tp1)
    h_f = jax.nn.relu(z_t @ p["w_f1z"] + a_t @ p["w_f1a"] + p["b_f1"])
    z_diff = h_f @ p["w_f2"] + p["b_f2"]
    lwm_vec = jnp.sum(((z_t + z_diff) - z_tp1) ** 2, axis=1)
    loss_wm = lwm_vec.mean()

    h_e = jax.nn.relu(x_t @ p["w_e1"] + p["b_e1"])
    mu = h_e @ p["w_mu"] + p["b_mu"]
    logvar = h_e @ p["w_lv"] + p["b_lv"]
    z = mu + jnp.exp(0.5 * logvar) * eps
    x_hat = jax.nn.relu(z @ p["w_d1"] + p["b_d1"]) @ p["w_d2"] + p["b_d2"]
    recon = jnp.sum((x_hat - x_t) ** 2, axis=1)
    kld = -0.5 * jnp.sum(1.0 + logvar - mu ** 2 - jnp.exp(logvar), axis=1)
    vae_loss = jnp.mean(recon + kld)
    return lwm_vec, vae_loss + loss_wm, loss_wm, vae_loss


if __name__ == "__main__":
    B, X_DIM, A_DIM, Z_DIM, H_DIM = 8, 32, 4, 8, 32

    key = jax.random.PRNGKey(0)
    k_p, k_xt, k_a, k_xtp1, k_eps = jax.random.split(key, 5)
    params = init_params(k_p, X_DIM, A_DIM, Z_DIM, H_DIM)
    packed = pack_params(params)   # packed once, reused every step

    x_t = jax.random.normal(k_xt, (B, X_DIM), jnp.float32)
    a_t = jax.random.normal(k_a, (B, A_DIM), jnp.float32)
    x_tp1 = x_t + 0.1 * jax.random.normal(k_xtp1, (B, X_DIM), jnp.float32)
    eps = jax.random.normal(k_eps, (B, Z_DIM), jnp.float32)

    lwm_vec, loss, loss_wm, vae_loss = vaefm_forward(x_t, a_t, x_tp1, eps, packed)
    jax.block_until_ready((lwm_vec, loss, loss_wm, vae_loss))

    # correctness check vs pure-JAX reference
    r_vec, r_loss, r_wm, r_vae = vaefm_reference(x_t, a_t, x_tp1, eps, params)
    assert jnp.allclose(lwm_vec, r_vec, atol=1e-4, rtol=1e-4)
    assert jnp.allclose(loss, r_loss, atol=1e-4, rtol=1e-4)
    assert jnp.allclose(loss_wm, r_wm, atol=1e-4, rtol=1e-4)
    assert jnp.allclose(vae_loss, r_vae, atol=1e-4, rtol=1e-4)

    loss_dict = {
        "wm_loss": float(loss),
        "wm_trans_loss": float(loss_wm),
        "wm_vae_loss": float(vae_loss),
    }
    _ = loss_dict  # bookkeeping floats, as in the reference module

    print("KERNEL_OK")
</pallas_src>

<mosaic_0001>
module attributes {stable_mosaic.version = 11 : i64} {
  func.func @vaefm_kernel(%arg0: memref<8x32xf32, #tpu.memory_space<vmem>>, %arg1: memref<8x32xf32, #tpu.memory_space<vmem>>, %arg2: memref<8x4xf32, #tpu.memory_space<vmem>>, %arg3: memref<8x8xf32, #tpu.memory_space<vmem>>, %arg4: memref<32x64xf32, #tpu.memory_space<vmem>>, %arg5: memref<64x24xf32, #tpu.memory_space<vmem>>, %arg6: memref<20x32xf32, #tpu.memory_space<vmem>>, %arg7: memref<32x40xf32, #tpu.memory_space<vmem>>, %arg8: memref<8x128xf32, #tpu.memory_space<vmem>>, %arg9: memref<8x128xf32, #tpu.memory_space<vmem>>, %arg10: memref<3xf32, #tpu.memory_space<smem>>) attributes {dimension_semantics = [], scalar_prefetch = 0 : i64, scratch_operands = 0 : i64, tpu.core_type = #tpu.core_type<tc>} {
    %c0 = arith.constant 0 : index
    %c0_0 = arith.constant 0 : index
    %0 = vector.load %arg0[%c0, %c0_0] : memref<8x32xf32, #tpu.memory_space<vmem>>, vector<8x32xf32>
    %c0_1 = arith.constant 0 : index
    %c0_2 = arith.constant 0 : index
    %1 = vector.load %arg1[%c0_1, %c0_2] : memref<8x32xf32, #tpu.memory_space<vmem>>, vector<8x32xf32>
    %c0_3 = arith.constant 0 : index
    %c0_4 = arith.constant 0 : index
    %2 = vector.load %arg2[%c0_3, %c0_4] : memref<8x4xf32, #tpu.memory_space<vmem>>, vector<8x4xf32>
    %c0_5 = arith.constant 0 : index
    %c0_6 = arith.constant 0 : index
    %3 = vector.load %arg3[%c0_5, %c0_6] : memref<8x8xf32, #tpu.memory_space<vmem>>, vector<8x8xf32>
    %c0_7 = arith.constant 0 : index
    %c0_8 = arith.constant 0 : index
    %4 = vector.load %arg4[%c0_7, %c0_8] : memref<32x64xf32, #tpu.memory_space<vmem>>, vector<32x64xf32>
    %c0_9 = arith.constant 0 : index
    %c0_10 = arith.constant 0 : index
    %5 = vector.load %arg5[%c0_9, %c0_10] : memref<64x24xf32, #tpu.memory_space<vmem>>, vector<64x24xf32>
    %c0_11 = arith.constant 0 : index
    %c0_12 = arith.constant 0 : index
    %6 = vector.load %arg6[%c0_11, %c0_12] : memref<20x32xf32, #tpu.memory_space<vmem>>, vector<20x32xf32>
    %c0_13 = arith.constant 0 : index
    %c0_14 = arith.constant 0 : index
    %7 = vector.load %arg7[%c0_13, %c0_14] : memref<32x40xf32, #tpu.memory_space<vmem>>, vector<32x40xf32>
    %c0_15 = arith.constant 0 : index
    %c0_16 = arith.constant 0 : index
    %8 = vector.load %arg8[%c0_15, %c0_16] : memref<8x128xf32, #tpu.memory_space<vmem>>, vector<8x128xf32>
    %9 = vector.extract_strided_slice %6 {offsets = [0, 0], sizes = [8, 32], strides = [1, 1]} : vector<20x32xf32> to vector<8x32xf32>
    %10 = vector.extract_strided_slice %6 {offsets = [8, 0], sizes = [8, 32], strides = [1, 1]} : vector<20x32xf32> to vector<8x32xf32>
    %11 = vector.extract_strided_slice %6 {offsets = [16, 0], sizes = [4, 32], strides = [1, 1]} : vector<20x32xf32> to vector<4x32xf32>
    %12 = vector.extract_strided_slice %7 {offsets = [0, 0], sizes = [32, 32], strides = [1, 1]} : vector<32x40xf32> to vector<32x32xf32>
    %13 = vector.extract_strided_slice %7 {offsets = [0, 32], sizes = [32, 8], strides = [1, 1]} : vector<32x40xf32> to vector<32x8xf32>
    %14 = vector.extract_strided_slice %8 {offsets = [0, 0], sizes = [1, 64], strides = [1, 1]} : vector<8x128xf32> to vector<1x64xf32>
    %15 = vector.extract_strided_slice %8 {offsets = [1, 0], sizes = [1, 24], strides = [1, 1]} : vector<8x128xf32> to vector<1x24xf32>
    %16 = vector.extract_strided_slice %8 {offsets = [2, 0], sizes = [1, 32], strides = [1, 1]} : vector<8x128xf32> to vector<1x32xf32>
    %17 = vector.extract_strided_slice %8 {offsets = [3, 0], sizes = [1, 32], strides = [1, 1]} : vector<8x128xf32> to vector<1x32xf32>
    %18 = vector.extract_strided_slice %8 {offsets = [4, 0], sizes = [1, 32], strides = [1, 1]} : vector<8x128xf32> to vector<1x32xf32>
    %19 = vector.extract_strided_slice %8 {offsets = [5, 0], sizes = [1, 8], strides = [1, 1]} : vector<8x128xf32> to vector<1x8xf32>
    %20 = tpu.concatenate %0, %1 in 0 : vector<8x32xf32>, vector<8x32xf32> -> vector<16x32xf32>
    %cst = arith.constant dense<0.000000e+00> : vector<16x64xf32>
    %21 = tpu.matmul %20, %4, %cst {dimension_numbers = #tpu.dot_dimension_numbers<[1], [0], [0], [1], [0, 0, 1, 1], [], []>} : vector<16x32xf32>, vector<32x64xf32>, vector<16x64xf32> -> vector<16x64xf32>
    %22 = vector.broadcast %14 : vector<1x64xf32> to vector<16x64xf32>
    %23 = arith.addf %21, %22 : vector<16x64xf32>
    %cst_17 = arith.constant 0.000000e+00 : f32
    %24 = vector.broadcast %cst_17 : f32 to vector<16x64xf32>
    %25 = arith.maximumf %23, %24 : vector<16x64xf32>
    %cst_18 = arith.constant dense<0.000000e+00> : vector<16x24xf32>
    %26 = tpu.matmul %25, %5, %cst_18 {dimension_numbers = #tpu.dot_dimension_numbers<[1], [0], [0], [1], [0, 0, 1, 1], [], []>} : vector<16x64xf32>, vector<64x24xf32>, vector<16x24xf32> -> vector<16x24xf32>
    %27 = vector.broadcast %15 : vector<1x24xf32> to vector<16x24xf32>
    %28 = arith.addf %26, %27 : vector<16x24xf32>
    %29 = vector.extract_strided_slice %28 {offsets = [0, 0], sizes = [8, 8], strides = [1, 1]} : vector<16x24xf32> to vector<8x8xf32>
    %30 = vector.extract_strided_slice %28 {offsets = [8, 0], sizes = [8, 8], strides = [1, 1]} : vector<16x24xf32> to vector<8x8xf32>
    %31 = vector.extract_strided_slice %28 {offsets = [0, 8], sizes = [8, 8], strides = [1, 1]} : vector<16x24xf32> to vector<8x8xf32>
    %32 = vector.extract_strided_slice %28 {offsets = [0, 16], sizes = [8, 8], strides = [1, 1]} : vector<16x24xf32> to vector<8x8xf32>
    %cst_19 = arith.constant dense<0.000000e+00> : vector<8x32xf32>
    %33 = tpu.matmul %29, %10, %cst_19 {dimension_numbers = #tpu.dot_dimension_numbers<[1], [0], [0], [1], [0, 0, 1, 1], [], []>} : vector<8x8xf32>, vector<8x32xf32>, vector<8x32xf32> -> vector<8x32xf32>
    %cst_20 = arith.constant dense<0.000000e+00> : vector<8x32xf32>
    %34 = tpu.matmul %2, %11, %cst_20 {dimension_numbers = #tpu.dot_dimension_numbers<[1], [0], [0], [1], [0, 0, 1, 1], [], []>} : vector<8x4xf32>, vector<4x32xf32>, vector<8x32xf32> -> vector<8x32xf32>
    %35 = arith.addf %33, %34 : vector<8x32xf32>
    %36 = vector.broadcast %18 : vector<1x32xf32> to vector<8x32xf32>
    %37 = arith.addf %35, %36 : vector<8x32xf32>
    %cst_21 = arith.constant 0.000000e+00 : f32
    %38 = vector.broadcast %cst_21 : f32 to vector<8x32xf32>
    %39 = arith.maximumf %37, %38 : vector<8x32xf32>
    %cst_22 = arith.constant dense<0.000000e+00> : vector<8x8xf32>
    %40 = tpu.matmul %39, %13, %cst_22 {dimension_numbers = #tpu.dot_dimension_numbers<[1], [0], [0], [1], [0, 0, 1, 1], [], []>} : vector<8x32xf32>, vector<32x8xf32>, vector<8x8xf32> -> vector<8x8xf32>
    %41 = vector.broadcast %19 : vector<1x8xf32> to vector<8x8xf32>
    %42 = arith.addf %40, %41 : vector<8x8xf32>
    %43 = arith.addf %29, %42 : vector<8x8xf32>
    %44 = arith.subf %43, %30 : vector<8x8xf32>
    %45 = arith.mulf %44, %44 : vector<8x8xf32>
    %cst_23 = arith.constant dense<0.000000e+00> : vector<8xf32>
    %46 = vector.multi_reduction <add>, %45, %cst_23 [1] : vector<8x8xf32> to vector<8xf32>
    %47 = vector.shape_cast %46 : vector<8xf32> to vector<8x1xf32>
    %48 = vector.shape_cast %47 : vector<8x1xf32> to vector<8x1xf32>
    %49 = vector.broadcast %48 : vector<8x1xf32> to vector<8x128xf32>
    %c0_24 = arith.constant 0 : index
    %c0_25 = arith.constant 0 : index
    %50 = vector.load %arg9[%c0_24, %c0_25] : memref<8x128xf32, #tpu.memory_space<vmem>>, vector<8x128xf32>
    tpu.vector_store %arg9[%c0_24, %c0_25], %49 {strides = array<i32>} : memref<8x128xf32, #tpu.memory_space<vmem>>, vector<8x128xf32>,
    %cst_26 = arith.constant 5.000000e-01 : f32
    %51 = vector.broadcast %cst_26 : f32 to vector<8x8xf32>
    %52 = arith.mulf %51, %32 : vector<8x8xf32>
    %53 = math.exp %52 : vector<8x8xf32>
    %54 = arith.mulf %53, %3 : vector<8x8xf32>
    %55 = arith.addf %31, %54 : vector<8x8xf32>
    %cst_27 = arith.constant dense<0.000000e+00> : vector<8x32xf32>
    %56 = tpu.matmul %55, %9, %cst_27 {dimension_numbers = #tpu.dot_dimension_numbers<[1], [0], [0], [1], [0, 0, 1, 1], [], []>} : vector<8x8xf32>, vector<8x32xf32>, vector<8x32xf32> -> vector<8x32xf32>
    %57 = vector.broadcast %16 : vector<1x32xf32> to vector<8x32xf32>
    %58 = arith.addf %56, %57 : vector<8x32xf32>
    %cst_28 = arith.constant 0.000000e+00 : f32
    %59 = vector.broadcast %cst_28 : f32 to vector<8x32xf32>
    %60 = arith.maximumf %58, %59 : vector<8x32xf32>
    %cst_29 = arith.constant dense<0.000000e+00> : vector<8x32xf32>
    %61 = tpu.matmul %60, %12, %cst_29 {dimension_numbers = #tpu.dot_dimension_numbers<[1], [0], [0], [1], [0, 0, 1, 1], [], []>} : vector<8x32xf32>, vector<32x32xf32>, vector<8x32xf32> -> vector<8x32xf32>
    %62 = vector.broadcast %17 : vector<1x32xf32> to vector<8x32xf32>
    %63 = arith.addf %61, %62 : vector<8x32xf32>
    %64 = arith.subf %63, %0 : vector<8x32xf32>
    %65 = arith.mulf %64, %64 : vector<8x32xf32>
    %cst_30 = arith.constant dense<0.000000e+00> : vector<8xf32>
    %66 = vector.multi_reduction <add>, %65, %cst_30 [1] : vector<8x32xf32> to vector<8xf32>
    %67 = vector.shape_cast %66 : vector<8xf32> to vector<8x1xf32>
    %cst_31 = arith.constant 1.000000e+00 : f32
    %68 = vector.broadcast %cst_31 : f32 to vector<8x8xf32>
    %69 = arith.addf %68, %32 : vector<8x8xf32>
    %70 = arith.mulf %31, %31 : vector<8x8xf32>
    %71 = arith.subf %69, %70 : vector<8x8xf32>
    %72 = math.exp %32 : vector<8x8xf32>
    %73 = arith.subf %71, %72 : vector<8x8xf32>
    %cst_32 = arith.constant dense<0.000000e+00> : vector<8xf32>
    %74 = vector.multi_reduction <add>, %73, %cst_32 [1] : vector<8x8xf32> to vector<8xf32>
    %75 = vector.shape_cast %74 : vector<8xf32> to vector<8x1xf32>
    %cst_33 = arith.constant -5.000000e-01 : f32
    %76 = vector.broadcast %cst_33 : f32 to vector<8x1xf32>
    %77 = arith.mulf %76, %75 : vector<8x1xf32>
    %78 = vector.shape_cast %47 : vector<8x1xf32> to vector<1x8x1xf32>
    %cst_34 = arith.constant dense<0.000000e+00> : vector<1xf32>
    %79 = vector.multi_reduction <add>, %78, %cst_34 [1, 2] : vector<1x8x1xf32> to vector<1xf32>
    %80 = vector.shape_cast %79 : vector<1xf32> to vector<1x1x1xf32>
    %81 = vector.extract %80[0, 0, 0] : f32 from vector<1x1x1xf32>
    %cst_35 = arith.constant 1.250000e-01 : f32
    %82 = arith.mulf %81, %cst_35 : f32
    %83 = arith.addf %67, %77 : vector<8x1xf32>
    %84 = vector.shape_cast %83 : vector<8x1xf32> to vector<1x8x1xf32>
    %cst_36 = arith.constant dense<0.000000e+00> : vector<1xf32>
    %85 = vector.multi_reduction <add>, %84, %cst_36 [1, 2] : vector<1x8x1xf32> to vector<1xf32>
    %86 = vector.shape_cast %85 : vector<1xf32> to vector<1x1x1xf32>
    %87 = vector.extract %86[0, 0, 0] : f32 from vector<1x1x1xf32>
    %cst_37 = arith.constant 1.250000e-01 : f32
    %88 = arith.mulf %87, %cst_37 : f32
    %89 = arith.addf %88, %82 : f32
    %c0_38 = arith.constant 0 : index
    %90 = memref.load %arg10[%c0_38] : memref<3xf32, #tpu.memory_space<smem>>
    memref.store %89, %arg10[%c0_38] : memref<3xf32, #tpu.memory_space<smem>>
    %c1 = arith.constant 1 : index
    %91 = memref.load %arg10[%c1] : memref<3xf32, #tpu.memory_space<smem>>
    memref.store %82, %arg10[%c1] : memref<3xf32, #tpu.memory_space<smem>>
    %c2 = arith.constant 2 : index
    %92 = memref.load %arg10[%c2] : memref<3xf32, #tpu.memory_space<smem>>
    memref.store %88, %arg10[%c2] : memref<3xf32, #tpu.memory_space<smem>>
    return
  }
}

</mosaic_0001>

<bundles_post_ra>
// kernel: vaefm_forward.1
= control target key start
LH: loop header
LB: loop body
LE: loop exit
PB: predicated region body
PF: predicated region fallthrough
CT: control target
= control target key end

     0   :  { %16 = vsyncpa [#allocation3], 0  ;;  %s1257_s0 = inlined_call_operand.vmem [shape: f32[8,32], index: 0, kind: input, shape index: {}]   ;;  %s1258_s1 = inlined_call_operand.hbm [shape: f32[8,32], index: 1, kind: input, shape index: {}]   ;;  %s1259_s2 = inlined_call_operand.vmem [shape: f32[8,4], index: 2, kind: input, shape index: {}]   ;;  %s1260_s3 = inlined_call_operand.hbm [shape: f32[8,8], index: 3, kind: input, shape index: {}]   ;;  %s1261_s4 = inlined_call_operand.vmem [shape: f32[32,64], index: 4, kind: input, shape index: {}]   ;;  %s1262_s5 = inlined_call_operand.vmem [shape: f32[64,24], index: 5, kind: input, shape index: {}]   ;;  %s1263_s6 = inlined_call_operand.vmem [shape: f32[20,32], index: 6, kind: input, shape index: {}]   ;;  %s1264_s7 = inlined_call_operand.vmem [shape: f32[32,40], index: 7, kind: input, shape index: {}]   ;;  %s1265_s8 = inlined_call_operand.hbm [shape: f32[8,128], index: 8, kind: input, shape index: {}]   ;;  %s1266_s9 = inlined_call_operand.vmem [shape: f32[8,128], index: 9, kind: output, shape index: {0}]   ;;  %s1267_s10 = inlined_call_operand.vmem [shape: f32[3], index: 10, kind: output, shape index: {1}]  }
   0x1   :  { %17 = vsyncpa [#allocation6], 0 }
   0x2   :  { %18 = vsyncpa [#allocation4], 0  ;;  %s1030_s13 = smov [#allocation5]   ;;  %s1031_s15 = smov [#allocation2]  }
   0x3   :  { %s39_s14 = sshll.u32 %s1030_s13, 4  ;;  %s27_s16 = sshll.u32 %s1031_s15, 4  ;;  %s40_s14 = int_to_ptr.vmem [resolvable:$true] %s39_s14  ;;  %s28_s16 = int_to_ptr.vmem [resolvable:$true] %s27_s16 }
   0x4   :  { %s946_s19 = scalar_lea.hbm %s1260_s3, 128 }
   0x5   :  { %p947_p0 = scmp.ne.s32.totalorder %s1260_s3, %s946_s19  ;;  %p950_p1 = scmp.lt.u32.totalorder %s946_s19, %s1260_s3 }
   0x7   :  { %p952_p2 = pnand %p950_p1, %p947_p0 }
   0x9   :  { %955 = shalt.err (!%p952_p2)
}
   0xa   :  { %s956_s24 = scalar_lea.vmem %s40_s14, 128  ;;  %p961_p4 = scmp.lt.s32.totalorder %s40_s14, %s40_s14 }
   0xb   :  { %p957_p3 = scmp.ne.s32.totalorder %s40_s14, %s956_s24  ;;  %p962_p5 = scmp.lt.s32.totalorder %s956_s24, %s956_s24 }
   0xd   :  { %p963_p6 = por %p962_p5, %p961_p4 }
   0xf   :  { %p964_p7 = pnand %p963_p6, %p957_p3 }
  0x11   :  { %967 = shalt.err (!%p964_p7)
}
  0x12   :  { %42 = dma.hbm_to_vmem [thread:$0]  %s1260_s3, 128, %s40_s14, [#allocation6]  }
  0x13   :  { %s968_s29 = scalar_lea.hbm %s1258_s1, 128 }
  0x14   :  { %p969_p8 = scmp.ne.s32.totalorder %s1258_s1, %s968_s29  ;;  %p972_p9 = scmp.lt.u32.totalorder %s968_s29, %s1258_s1 }
  0x16   :  { %p974_p10 = pnand %p972_p9, %p969_p8 }
  0x18   :  { %977 = shalt.err (!%p974_p10)
}
  0x19   :  { %s978_s15 = scalar_lea.vmem %s28_s16, 128  ;;  %p983_p12 = scmp.lt.s32.totalorder %s28_s16, %s28_s16 }
  0x1a   :  { %p979_p11 = scmp.ne.s32.totalorder %s28_s16, %s978_s15  ;;  %p984_p13 = scmp.lt.s32.totalorder %s978_s15, %s978_s15 }
  0x1c   :  { %p985_p0 = por %p984_p13, %p983_p12 }
  0x1e   :  { %p986_p1 = pnand %p985_p0, %p979_p11 }
  0x20   :  { %989 = shalt.err (!%p986_p1)
}
  0x21   :  { %30 = dma.hbm_to_vmem [thread:$0]  %s1258_s1, 128, %s28_s16, [#allocation3]  }
  0x22   :  { %s1032_s17 = smov [#allocation7]   ;;  %s990_s21 = scalar_lea.hbm %s1265_s8, 128 }
  0x23   :  { %s57_s18 = sshll.u32 %s1032_s17, 4  ;;  %p991_p2 = scmp.ne.s32.totalorder %s1265_s8, %s990_s21  ;;  %s58_s18 = int_to_ptr.vmem [resolvable:$true] %s57_s18 }
  0x24   :  { %p994_p3 = scmp.lt.u32.totalorder %s990_s21, %s1265_s8 }
  0x26   :  { %p996_p4 = pnand %p994_p3, %p991_p2 }
  0x28   :  { %999 = shalt.err (!%p996_p4)
}
  0x29   :  { %s1000_s26 = scalar_lea.vmem %s58_s18, 128  ;;  %p1005_p6 = scmp.lt.s32.totalorder %s58_s18, %s58_s18 }
  0x2a   :  { %p1001_p5 = scmp.ne.s32.totalorder %s58_s18, %s1000_s26  ;;  %p1006_p7 = scmp.lt.s32.totalorder %s1000_s26, %s1000_s26 }
  0x2c   :  { %p1007_p8 = por %p1006_p7, %p1005_p6 }
  0x2e   :  { %p1008_p9 = pnand %p1007_p8, %p1001_p5 }
  0x30   :  { %1011 = shalt.err (!%p1008_p9)
}
  0x31   :  { %60 = dma.hbm_to_vmem [thread:$0]  %s1265_s8, 128, %s58_s18, [#allocation6]  }
  0x32   :  { %1024 = dma.done.wait [#allocation3], 128  }
  0x33   :  { %1025 = vsyncadd [#allocation3], 4294967168 }
  0x34   :  { %1026 = dma.done.wait [#allocation6], 256  }
  0x35   :  { %1027 = vsyncadd [#allocation6], 4294967040  ;;  %vm98_vm0 = vcmask 261120   ;;  %v74_v0 = vld [vmem:[%s1261_s4] sm:$0xff]  ;;  %v75_v1 = vld [vmem:[%s1261_s4 + $0x8] sm:$0xff]  ;;  %vm272_vm1 = vcmask 1043456   ;;  %v94_v23 = vlaneseq }
  0x36   :  { %v76_v2 = vld [vmem:[%s1261_s4 + $0x10] sm:$0xff]  ;;  %v880_v3 = vpack.c.bf16 %v75_v1, %v74_v0  ;;  %v77_v4 = vld [vmem:[%s1261_s4 + $0x18] sm:$0xff]  ;;  %v1148_v5 = vld [vmem:[%s1257_s0] sm:$0xff]  ;;  %s1033_s30 = smov 16   ;;  %v1034_v22 = vmov 0.0   ;;  %vm1035_vm2 = vmmov 0  }
  0x37   :  { %v884_v6 = vpack.c.bf16 %v77_v4, %v76_v2  ;;  %821 = vmatprep.mubr.msk.f32.mxu0 %vm98_vm0, %v1148_v5  ;;  %v78_v7 = vld [vmem:[%s1262_s5] sm:$0xff]  ;;  %v79_v8 = vld [vmem:[%s1262_s5 + $0x8] sm:$0xff]  ;;  %v80_v9 = vld [vmem:[%s1262_s5 + $0x10] sm:$0xff]  ;;  %v1185_v24 = vshrl.u32 %v94_v23, 7  ;;  %vm186_vm3 = vcmask 523264   ;;  %vm268_vm4 = vcmask 31744  }
  0x38   :  { %881 = vmatprep.subr.bf16.mxu0 %v880_v3  ;;  %v888_v10 = vpack.c.bf16 %v79_v8, %v78_v7  ;;  %v81_v11 = vld [vmem:[%s1262_s5 + $0x18] sm:$0xff]  ;;  %v82_v13 = vld [vmem:[%s1262_s5 + $0x20] sm:$0xff]  ;;  %v83_v14 = vld [vmem:[%s1262_s5 + $0x28] sm:$0xff]  ;;  %vm346_vm5 = vcmask 64512   ;;  %s1036_s20 = smov 120   ;;  %s1037_s21 = smov 96  }
  0x39   :  { %883 = vmatpush3.bf16.msra.mxu0 %v880_v3  ;;  %v892_v12 = vpack.c.bf16 %v81_v11, %v80_v9  ;;  %v896_v15 = vpack.c.bf16 %v83_v14, %v82_v13  ;;  %v71_v16 = vld [vmem:[#allocation2] sm:$0xff]  ;;  %v84_v17 = vld [vmem:[%s1262_s5 + $0x30] sm:$0xff]  ;;  %v85_v18 = vld [vmem:[%s1262_s5 + $0x38] sm:$0xff]  ;;  %v96_v25 = vsub.s32 0, %v1185_v24  ;;  %v184_v36 = vsub.s32 1, %v1185_v24  ;;  %s758_s26 = sshll.u32 %s1267_s10, 4  ;;  %s759_s26 = int_to_ptr.vmem [resolvable:$true] %s758_s26 }
  0x3a   :  { %885 = vmatprep.subr.bf16.mxu0 %v884_v6  ;;  %889 = vmatprep.subr.bf16.mxu1 %v888_v10  ;;  %v900_v19 = vpack.c.bf16 %v85_v18, %v84_v17  ;;  %v73_v20 = vld [vmem:[#allocation5] sm:$0xff]  ;;  %v88_v21 = vld [vmem:[%s1263_s6 + $0x10] sm:$0xf]  ;;  %v72_v34 = vld [vmem:[%s1259_s2] sm:$0xff]  ;;  %v1038_v57 = vmov 0.0|0.0   ;;  %v422_v3 = vsub.s32 4, %v1185_v24  ;;  %p1017_p11 = scmp.lt.s32.totalorder %s759_s26, %s759_s26 }
  0x3b   :  { %891 = vmatpush3.bf16.msra.mxu1 %v888_v10  ;;  %530 = vrot.lane.b32.xlu0 %v73_v20, %s1033_s30  ;;  %v1188_v26 = vld [vmem:[#allocation7] sm:$0xff]  ;;  %v87_v35 = vld [vmem:[%s1263_s6 + $0x8] sm:$0xff]  ;;  %v89_v44 = vld [vmem:[%s1264_s7] sm:$0xff]  ;;  %v541_v23 = vsub.s32 2, %v1185_v24  ;;  %vm719_vm6 = vcmask 7168   ;;  %s1012_s29 = scalar_lea.vmem %s759_s26, 16 }
  0x3c   :  { %893 = vmatprep.subr.bf16.mxu1 %v892_v12  ;;  %v97_v27 = vrot.slane %v1188_v26, %v96_v25  ;;  %v185_v37 = vrot.slane %v1188_v26, %v184_v36  ;;  %v90_v45 = vld [vmem:[%s1264_s7 + $0x8] sm:$0xff]  ;;  %v91_v47 = vld [vmem:[%s1264_s7 + $0x10] sm:$0xff]  ;;  %v92_v48 = vld [vmem:[%s1264_s7 + $0x18] sm:$0xff]  ;;  %s1039_s7 = smov 8   ;;  %v423_v11 = vrot.slane %v1188_v26, %v422_v3  ;;  %p1013_p10 = scmp.ne.s32.totalorder %s759_s26, %s1012_s29 }
  0x3d   :  { %887 = vmatpush3.bf16.msra.mxu0 %v884_v6  ;;  %v911_v46 = vpack.c.bf16 %v90_v45, %v89_v44  ;;  %v914_v49 = vpack.c.bf16 %v92_v48, %v91_v47  ;;  %v937_v53 = vpack.i.bf16 %v92_v48, %v91_v47  ;;  %v86_v56 = vld [vmem:[%s1263_s6] sm:$0xff]  ;;  %v932_v60 = vpack.i.bf16 %v90_v45, %v89_v44  ;;  %s1040_s6 = smov 112   ;;  %p1018_p12 = scmp.lt.s32.totalorder %s1012_s29, %s1012_s29 }
  0x3e   :  { %843 = vmatprep.subr.mxu0 %v1034_v22  ;;  %v542_v25 = vrot.slane %v1188_v26, %v541_v23 }
  0x3f   :  { %895 = vmatpush3.bf16.msra.mxu1 %v892_v12  ;;  %p1019_p13 = por %p1018_p12, %p1017_p11 }
  0x40   :  { %822 = vmatmul.mubr.msk.f32.vlgmr.msra.gmra.mrb[0].mxu0 %vm98_vm0, %v71_v16  ;;  %897 = vmatprep.subr.bf16.mxu1 %v896_v15 }
  0x41   :  { %844 = vmatpush3.msk.msra.mxu0 %vm272_vm1, %v88_v21  ;;  %845 = vmatprep.mubr.msk.f32.mxu0 %vm1035_vm2, %v1034_v22  ;;  %p1020_p0 = pnand %p1019_p13, %p1013_p10 }
  0x42   :  { %848 = vmatprep.subr.mxu0 %v1034_v22 }
  0x43   :  { %899 = vmatpush3.bf16.msra.mxu1 %v896_v15 }
  0x44   :  { %901 = vmatprep.subr.bf16.mxu1 %v900_v19  ;;  %846 = vmatmul.mubr.msk.f32.vlgmr.msra.gmra.mrb[2].mxu0 %vm268_vm4, %v72_v34 }
  0x45   :  { %850 = vmatprep.mubr.msk.f32.mxu0 %vm1035_vm2, %v1034_v22  ;;  %849 = vmatpush3.msra.mxu0 %v87_v35 }
  0x46   :  { %904 = vmatprep.subr.bf16.mxu0 %v1038_v57 }
  0x47   :  { %903 = vmatpush3.bf16.msra.mxu1 %v900_v19 }
  0x48   :  { %864 = vmatprep.subr.mxu1 %v1034_v22 }
  0xad   :  { %v531_v50 = vpop.permute.xlu0 %530 }
 0x113   :  { %v823_v28 = vpop.f32.mrb[0].mxu0 }
 0x114   :  { %v177_v29 = vadd.f32 %v823_v28, %v97_v27  ;;  %v171_v30 = vpop.f32.mrb[1].mxu0 }
 0x115   :  { %v172_v31 = vadd.f32 %v171_v30, %v97_v27 }
 0x116   :  { %v181_v33 = vmax.f32 %v177_v29, 0.0 }
 0x117   :  { %v180_v32 = vmax.f32 %v172_v31, 0.0  ;;  %v342_v54 = vpop.f32.mrb[2].mxu0  ;;  %v428_v31 = vsub.s32 5, %v1185_v24 }
 0x118   :  { %v847_v55 = vpop.f32.mrb[3].mxu0 }
 0x119   :  { %840 = vmatprep.mubr.msk.f32.mxu1 %vm186_vm3, %v180_v32  ;;  %v429_v32 = vrot.slane %v1188_v26, %v428_v31 }
 0x11a   :  { %841 = vmatmul.mubr.msk.f32.vlgmr.msra.gmra.mrb[0].mxu1 %vm186_vm3, %v181_v33 }
 0x11b   :  { %866 = vmatprep.mubr.msk.f32.mxu1 %vm1035_vm2, %v1034_v22  ;;  %865 = vmatpush3.msra.mxu1 %v86_v56 }
 0x11c   :  { %910 = vmatprep.subr.bf16.mxu1 %v1038_v57 }
 0x1ed   :  { %v842_v38 = vpop.f32.mrb[0].mxu1 }
 0x1ee   :  { %v1203_v39 = vadd.f32 %v842_v38, %v185_v37  ;;  %v259_v40 = vpop.f32.mrb[1].mxu1  ;;  %v621_v38 = vsub.s32 3, %v1185_v24 }
 0x1ef   :  { %v1205_v41 = vadd.f32 %v259_v40, %v185_v37 }
 0x1f0   :  { %v622_v40 = vrot.slane %v1188_v26, %v621_v38 }
 0x1f1   :  { %851 = vmatmul.mubr.msk.f32.vlgmr.msra.gmra.mrb[4].mxu0 %vm346_vm5, %v1205_v41  ;;  %v526_v42 = vmul.f32 0.5, %v1205_v41  ;;  %v702_v61 = vmul.f32 %v1205_v41, %v1205_v41  ;;  %v708_v1 = vmul.f32 1.442695, %v1205_v41  ;;  %v701_v13 = vadd.f32 1.0, %v1205_v41 }
 0x1f2   :  { %861 = vmatprep.mubr.msk.f32.mxu0 %vm1035_vm2, %v1034_v22 }
 0x1f3   :  { %v527_v43 = vmul.f32 1.442695, %v526_v42 }
 0x1f5   :  { %942 = vpow2.f32 %v527_v43 }
 0x1f6   :  { %944 = vpow2.f32 %v708_v1 }
 0x1ff   :  { %v943_v51 = vpop.eup %942 }
 0x200   :  { %v533_v52 = vmul.f32 %v943_v51, %v531_v50  ;;  %v945_v17 = vpop.eup %944 }
 0x202   :  { %535 = vrot.lane.b32.xlu0 %v533_v52, %s1036_s20 }
 0x206   :  { %938 = vrot.lane.b32.xlu0 %v937_v53, %s1037_s21 }
 0x274   :  { %v536_v58 = vpop.permute.xlu0 %535 }
 0x275   :  { %v538_v59 = vadd.f32 %v536_v58, %v1205_v41 }
 0x277   :  { %544 = vrot.lane.b32.xlu1 %v538_v59, %s1036_s20 }
 0x278   :  { %v939_v4 = vpop.permute.xlu0 %938 }
 0x279   :  { %v941_v9 = vunpack.i.h.bf16 %v939_v4  ;;  %v940_v10 = vunpack.i.l.bf16 %v939_v4 }
 0x27b   :  { %933 = vrot.lane.b32.xlu1 %v932_v60, %s1037_s21  ;;  %v908_v16 = vpack.c.bf16 %v941_v9, %v940_v10 }
 0x27f   :  { %704 = vrot.lane.b32.xlu1 %v702_v61, %s1039_s7 }
 0x2c4   :  { %v416_v62 = vpop.f32.mrb[4].mxu0 }
 0x2c5   :  { %v417_v63 = vadd.f32 %v416_v62, %v342_v54  ;;  %v852_v0 = vpop.f32.mrb[5].mxu0 }
 0x2c7   :  { %v424_v18 = vadd.f32 %v423_v11, %v417_v63 }
 0x2c9   :  { %v425_v20 = vmax.f32 %v424_v18, 0.0 }
 0x2e9   :  { %v545_v2 = vpop.permute.xlu1 %544 }
 0x2ea   :  { %867 = vmatmul.mubr.msk.f32.vlgmr.msra.gmra.mrb[2].mxu1 %vm346_vm5, %v545_v2 }
 0x2eb   :  { %912 = vmatpush3.bf16.msra.mxu1 %v911_v46  ;;  %877 = vmatprep.mubr.msk.f32.mxu1 %vm1035_vm2, %v1034_v22 }
 0x2ec   :  { %913 = vmatprep.subr.bf16.mxu1 %v1038_v57 }
 0x2ed   :  { %v934_v6 = vpop.permute.xlu1 %933 }
 0x2ee   :  { %v936_v7 = vunpack.i.h.bf16 %v934_v6  ;;  %v935_v8 = vunpack.i.l.bf16 %v934_v6 }
 0x2ef   :  { %915 = vmatpush3.bf16.msra.mxu1 %v914_v49 }
 0x2f0   :  { %v905_v12 = vpack.c.bf16 %v936_v7, %v935_v8 }
 0x2f1   :  { %v705_v14 = vpop.permute.xlu1 %704 }
 0x2f2   :  { %v707_v15 = vsub.f32 %v701_v13, %v705_v14  ;;  %906 = vmatpush3.bf16.msra.mxu0 %v905_v12 }
 0x2f3   :  { %907 = vmatprep.subr.bf16.mxu0 %v1038_v57 }
 0x2f4   :  { %v710_v19 = vsub.f32 %v707_v15, %v945_v17 }
 0x2f6   :  { %712 = vrot.lane.b32.xlu0 %v710_v19, %s1040_s6  ;;  %909 = vmatpush3.bf16.msra.mxu0 %v908_v16 }
 0x2f9   :  { %862 = vmatmul.mubr.msk.f32.vlgmr.msra.gmra.mrb[6].mxu0 %vm98_vm0, %v425_v20 }
 0x368   :  { %v713_v21 = vpop.permute.xlu0 %712 }
 0x369   :  { %v715_v22 = vsel %vm346_vm5, %v713_v21, 0.0 }
 0x36a   :  { %716 = vadd.xlane.f32.xlu1 %v715_v22 }
 0x3bd   :  { %v614_v27 = vpop.f32.mrb[2].mxu1 }
 0x3be   :  { %v615_v28 = vadd.f32 %v614_v27, %v542_v25  ;;  %v868_v29 = vpop.f32.mrb[3].mxu1 }
 0x3c0   :  { %v618_v30 = vmax.f32 %v615_v28, 0.0 }
 0x3c2   :  { %878 = vmatmul.mubr.msk.f32.vlgmr.msra.gmra.mrb[4].mxu1 %vm98_vm0, %v618_v30 }
 0x3cc   :  { %v515_v33 = vpop.f32.mrb[6].mxu0 }
 0x3cd   :  { %v516_v34 = vadd.f32 %v515_v33, %v429_v32  ;;  %v863_v35 = vpop.f32.mrb[7].mxu0 }
 0x3cf   :  { %v519_v36 = vadd.f32 %v516_v34, %v1205_v41 }
 0x3d1   :  { %v520_v37 = vsub.f32 %v519_v36, %v1203_v39 }
 0x3d3   :  { %v521_v48 = vmul.f32 %v520_v37, %v520_v37 }
 0x3d5   :  { %v522_v49 = vsel %vm346_vm5, %v521_v48, 0.0 }
 0x3f7   :  { %v717_v41 = vpop.xlane.xlu1 %716 }
 0x3f8   :  { %v718_v50 = vmul.f32 -0.5, %v717_v41 }
 0x495   :  { %v692_v42 = vpop.f32.mrb[4].mxu1 }
 0x496   :  { %v693_v43 = vadd.f32 %v692_v42, %v622_v40  ;;  %v879_v44 = vpop.f32.mrb[5].mxu1 }
 0x498   :  { %v696_v45 = vsub.f32 %v693_v43, %v1148_v5 }
 0x49a   :  { %v697_v46 = vmul.f32 %v696_v45, %v696_v45 }
 0x49c   :  { %v698_v47 = vsel %vm98_vm0, %v697_v46, 0.0 }
 0x49d   :  { %699 = vadd.xlane.f32.xlu0 %v698_v47 }
 0x4a1   :  { %523 = vadd.xlane.f32.xlu0 %v522_v49 }
 0x52a   :  { %v700_v39 = vpop.xlane.xlu0 %699 }
 0x52b   :  { %v731_v24 = vadd.f32 %v718_v50, %v700_v39 }
 0x52d   :  { %v732_v51 = vsel %vm719_vm6, %v731_v24, 0.0 }
 0x52e   :  { %733 = vadd.xlane.f32.xlu0 %v732_v51  ;;  %v524_v26 = vpop.xlane.xlu0 %523 }
 0x52f   :  { %525 = vst [vmem:[%s1266_s9] sm:$0xff] %v524_v26  ;;  %v720_v5 = vsel %vm719_vm6, %v524_v26, 0.0 }
 0x530   :  { %721 = vadd.xlane.f32.xlu1 %v720_v5 }
 0x5bb   :  { %v734_v52 = vpop.xlane.xlu0 %733 }
 0x5bc   :  { %v735_v53 = vrot.slane %v734_v52, 4 }
 0x5bd   :  { %v722_v54 = vpop.xlane.xlu1 %721 }
 0x5be   :  { %v736_v55 = vadd.f32 %v735_v53, %v734_v52  ;;  %v723_v56 = vrot.slane %v722_v54, 4 }
 0x5c0   :  { %v737_v57 = vrot.slane %v736_v55, 2  ;;  %v724_v58 = vadd.f32 %v723_v56, %v722_v54 }
 0x5c2   :  { %v738_v59 = vadd.f32 %v737_v57, %v736_v55  ;;  %v725_v60 = vrot.slane %v724_v58, 2 }
 0x5c4   :  { %v726_v61 = vadd.f32 %v725_v60, %v724_v58  ;;  %v739_v62 = vrot.slane %v738_v59, 1 }
 0x5c6   :  { %v727_v63 = vrot.slane %v726_v61, 1  ;;  %v740_v1 = vadd.f32 %v739_v62, %v738_v59 }
 0x5c8   :  { %v728_v0 = vadd.f32 %v727_v63, %v726_v61 }
 0x5ca   :  { %916 = vpush %v728_v0 }
 0x5cb   :  { %918 = vpush %v740_v1 }
 0x5fb   :  { %s917_s24 = spop %916 }
 0x5fc   :  { %s730_s1 = smul.f32 0.125, %s917_s24  ;;  %s919_s16 = spop %918 }
 0x5fd   :  { %s742_s27 = smul.f32 0.125, %s919_s16 }
 0x5fe   :  { %747 = sst [smem:[#allocation8 + $0x1]] %s730_s1 }
 0x5ff   :  { %s743_s28 = sadd.f32 %s742_s27, %s730_s1 }
 0x600   :  { %749 = sst [smem:[#allocation8 + $0x2]] %s742_s27 }
 0x601   :  { %745 = sst [smem:[#allocation8]] %s743_s28 }
 0x602   :  { %1023 = shalt.err (!%p1020_p0)
}
 0x603   :  { %s1041_s30 = smov [#allocation8]  }
 0x604   :  { %761 = dma.smem_to_vmem %s1041_s30, 16, %s759_s26, [#allocation4]  }
 0x605   :  { %1028 = dma.done.wait [#allocation4], 16  }
 0x606   :  { %1029 = vsyncadd [#allocation4], 4294967280 }
 0x607   :  { %767 = sfence }
 0x608   :  { %768 = vsyncpa [#allocation3], 1 }
 0x609   :  { %769 = vsyncpa [#allocation6], 1 }
 0x60a   :  { %770 = vsyncpa [#allocation4], 1 }

</bundles_post_ra>
